<compile_context>
chip_gen: v5e
topology: v5e:2x2
jax: 0.10.0
libtpu: 0.0.40
codegen_flags: <defaults>
</compile_context>

<pallas_src>
import functools

import jax
import jax.numpy as jnp
from jax.experimental import pallas as pl
from jax.experimental.pallas import tpu as pltpu

GEM_P = 3.0          # GeM default, freeze_p=True
GEM_EPS = 1e-6
BN_EPS = 1e-5

# Per-input-block VMEM budget in PADDED bytes. Double-buffered => ~28 MiB of input buffers,
# leaving headroom under the 48 MiB scoped limit on v5e/v6e (128 MiB phys) and v7x (64 MiB phys).
_VMEM_BLOCK_BUDGET = 14 * 1024 * 1024
_VMEM_LIMIT_BYTES = 48 * 1024 * 1024


def _round_up(x, m):
    return (x + m - 1) // m * m


def _gem_bn_kernel(x_ref, scale_ref, shift_ref, gfeat_ref, feat_ref, *, inv_hw):
    # x_ref: (Bt, HW, C) -- channels on the lane axis (dense, multiple of 128 for real
    # backbones), spatial HW on the sublane axis. f32 upcast happens in-register.
    x = x_ref[...].astype(jnp.float32)

    # GeM: clamp(min=eps) -> pow(3) -> spatial mean -> cube root.
    xc = jnp.maximum(x, GEM_EPS)
    xp = xc * xc * xc                                  # p == 3.0 exactly (frozen)
    # Spatial reduce over the sublane axis: cross-vreg VPU adds + one 8-wide sublane reduce
    # (no XLU lane reduce), then a single 1/HW scale on the tiny pooled result.
    pooled = jnp.sum(xp, axis=1) * inv_hw              # (Bt, C)
    gem = jnp.exp(jnp.log(pooled) * (1.0 / GEM_P))     # pooled >= eps^3 > 0; EUP log/exp

    gfeat_ref[...] = gem                               # global_feat (pre-BN)
    # Eval-mode BatchNorm1d folded into per-channel scale/shift: feat = gem * scale + shift.
    feat_ref[...] = gem * scale_ref[...] + shift_ref[...]


def backbone_infer_head(x_nhwc, gamma, beta, running_mean, running_var):
    """GeM pooling + eval-mode BN bottleneck on the backbone feature map.

    x_nhwc: (B, H, W, C) feature map in its native dtype (bf16 recommended: this op is a
    pure HBM stream, so bf16 input halves the bytes read; the kernel upcasts in-register).

    Returns (feat, global_feat), both (B, C) float32. The module (neck='bnneck',
    neck_feat='after', eval mode) returns `feat`.
    """
    B, H, W, C = x_nhwc.shape
    HW = H * W
    x = x_nhwc.reshape(B, HW, C)      # layout-free reshape; C stays on the lane axis

    # Fold eval-mode BN into two tiny per-channel vectors on the host.
    scale_v = gamma.astype(jnp.float32) * jax.lax.rsqrt(
        running_var.astype(jnp.float32) + BN_EPS)
    shift_v = beta.astype(jnp.float32) - running_mean.astype(jnp.float32) * scale_v
    scale = scale_v.reshape(1, C)
    shift = shift_v.reshape(1, C)

    # Padding-aware VMEM sizing: HW pads to the sublane pack (8 for f32, 16 for bf16),
    # C pads to 128 lanes (a no-op for real backbones where C is a multiple of 128).
    itemsize = jnp.dtype(x.dtype).itemsize
    sublane_pack = 8 * max(1, 4 // itemsize)
    padded_row_bytes = _round_up(HW, sublane_pack) * _round_up(C, 128) * itemsize

    bt = max(1, _VMEM_BLOCK_BUDGET // padded_row_bytes)
    if B >= 16:
        # v7x megacore: keep >= 2 grid steps so both TensorCores get work with
        # dimension_semantics=("parallel",); harmless on v5e/v6e (~0.35 us per extra step).
        bt = min(bt, _round_up(pl.cdiv(B, 2), 8))
    if bt >= B or B <= 8:
        bt = B                         # single full-B tile (block == full dim is legal)
    else:
        bt = max(8, (bt // 8) * 8)     # multiple-of-8 sublane tiles -> unmasked stores
    grid = (pl.cdiv(B, bt),)

    kernel = functools.partial(_gem_bn_kernel, inv_hw=1.0 / float(HW))

    cost = pl.CostEstimate(
        flops=4 * B * C * HW + 4 * B * C,
        transcendentals=2 * B * C,
        bytes_accessed=B * C * HW * itemsize + 2 * B * C * 4 + 2 * C * 4,
    )

    gfeat, feat = pl.pallas_call(
        kernel,
        grid=grid,
        in_specs=[
            # Only B is tiled; HW and C are full dims (satisfies the (8,128) rule even for
            # awkward HW like 49). GeM is row-independent, so the Pallas-padded rows of a
            # ragged last B tile are safe: maximum(x, eps) keeps log() finite and the padded
            # output rows are masked out of the store.
            pl.BlockSpec((bt, HW, C), lambda b: (b, 0, 0)),
            pl.BlockSpec((1, C), lambda b: (0, 0)),
            pl.BlockSpec((1, C), lambda b: (0, 0)),
        ],
        out_specs=(
            pl.BlockSpec((bt, C), lambda b: (b, 0)),
            pl.BlockSpec((bt, C), lambda b: (b, 0)),
        ),
        out_shape=(
            jax.ShapeDtypeStruct((B, C), jnp.float32),  # global_feat
            jax.ShapeDtypeStruct((B, C), jnp.float32),  # feat (after BN)
        ),
        compiler_params=pltpu.CompilerParams(
            dimension_semantics=("parallel",),           # megacore sharding on v7x
            vmem_limit_bytes=_VMEM_LIMIT_BYTES),
        cost_estimate=cost,
    )(x, scale, shift)

    # neck == 'bnneck', neck_feat == 'after' -> the module returns the post-BN feature.
    return feat, gfeat


def backbone_infer_head_nchw(x_nchw, gamma, beta, running_mean, running_var):
    """NCHW entry point (PyTorch layout). A JAX backbone on TPU produces NHWC natively, so
    prefer backbone_infer_head; from a true NCHW tensor this costs one XLA transpose pass."""
    x_nhwc = jnp.transpose(x_nchw, (0, 2, 3, 1))
    return backbone_infer_head(x_nhwc, gamma, beta, running_mean, running_var)


def _reference_nchw(x_nchw, gamma, beta, running_mean, running_var):
    xf = x_nchw.astype(jnp.float32)
    pooled = jnp.mean(jnp.maximum(xf, GEM_EPS) ** GEM_P, axis=(2, 3))   # (B, C)
    gem = pooled ** (1.0 / GEM_P)
    feat = (gem - running_mean) / jnp.sqrt(running_var + BN_EPS) * gamma + beta
    return feat, gem


def _check(x_nchw, gamma, beta, running_mean, running_var, atol, rtol):
    feat, gfeat = backbone_infer_head_nchw(x_nchw, gamma, beta, running_mean, running_var)
    feat = jax.block_until_ready(feat)
    gfeat = jax.block_until_ready(gfeat)
    ref_feat, ref_gfeat = _reference_nchw(x_nchw, gamma, beta, running_mean, running_var)
    assert jnp.allclose(feat, ref_feat, atol=atol, rtol=rtol), "feat mismatch"
    assert jnp.allclose(gfeat, ref_gfeat, atol=atol, rtol=rtol), "global_feat mismatch"


if __name__ == "__main__":
    key = jax.random.PRNGKey(0)
    k1, k2, k3, k4, k5 = jax.random.split(key, 5)

    # --- Test 1: small f32, single tile; module-init BN params -----------------------------
    # weights_init_kaiming on BatchNorm1d -> weight=1, bias=0; fresh running stats -> 0 / 1.
    B, C, H, W = 2, 32, 16, 16
    x1 = jax.random.normal(k1, (B, C, H, W), dtype=jnp.float32)
    _check(x1,
           jnp.ones((C,), jnp.float32), jnp.zeros((C,), jnp.float32),
           jnp.zeros((C,), jnp.float32), jnp.ones((C,), jnp.float32),
           atol=1e-4, rtol=1e-4)

    # --- Test 2: multi-tile grid (ragged last batch tile), non-trivial BN fold --------------
    B, C, H, W = 20, 256, 7, 7       # HW=49: not lane/sublane aligned -> exercises full-dim rule
    x2 = jax.random.normal(k2, (B, C, H, W), dtype=jnp.float32)
    gamma2 = jax.random.normal(k3, (C,), jnp.float32) * 0.1 + 1.0
    beta2 = jax.random.normal(k4, (C,), jnp.float32) * 0.1
    mean2 = jax.random.normal(k5, (C,), jnp.float32) * 0.1
    var2 = jax.random.uniform(k3, (C,), jnp.float32, minval=0.5, maxval=1.5)
    _check(x2, gamma2, beta2, mean2, var2, atol=1e-4, rtol=1e-4)

    # --- Test 3: bf16 feature map (in-register upcast path) ---------------------------------
    B, C, H, W = 4, 128, 8, 8
    x3 = jax.random.normal(k4, (B, C, H, W), dtype=jnp.float32).astype(jnp.bfloat16)
    _check(x3,
           jnp.ones((C,), jnp.float32), jnp.zeros((C,), jnp.float32),
           jnp.zeros((C,), jnp.float32), jnp.ones((C,), jnp.float32),
           atol=2e-3, rtol=2e-3)

    print("KERNEL_OK")
</pallas_src>

<mosaic_0001>
module attributes {stable_mosaic.version = 11 : i64} {
  func.func @_gem_bn_kernel(%arg0: i32, %arg1: memref<2x256x32xf32, #tpu.memory_space<vmem>>, %arg2: memref<1x32xf32, #tpu.memory_space<vmem>>, %arg3: memref<1x32xf32, #tpu.memory_space<vmem>>, %arg4: memref<2x32xf32, #tpu.memory_space<vmem>>, %arg5: memref<2x32xf32, #tpu.memory_space<vmem>>) attributes {dimension_semantics = [#tpu.dimension_semantics<parallel>], iteration_bounds = array<i64: 1>, scalar_prefetch = 0 : i64, scratch_operands = 0 : i64, tpu.core_type = #tpu.core_type<tc>, window_params = [{transform_indices = @transform_0, window_bounds = array<i64: 2, 256, 32>}, {pipeline_mode = #tpu.pipeline_mode<synchronous>, transform_indices = @transform_1, window_bounds = array<i64: 1, 32>}, {pipeline_mode = #tpu.pipeline_mode<synchronous>, transform_indices = @transform_2, window_bounds = array<i64: 1, 32>}, {transform_indices = @transform_3, window_bounds = array<i64: 2, 32>}, {transform_indices = @transform_4, window_bounds = array<i64: 2, 32>}]} {
    %c0 = arith.constant 0 : index
    %c0_0 = arith.constant 0 : index
    %c0_1 = arith.constant 0 : index
    %0 = vector.load %arg1[%c0, %c0_0, %c0_1] : memref<2x256x32xf32, #tpu.memory_space<vmem>>, vector<2x256x32xf32>
    %cst = arith.constant 9.99999997E-7 : f32
    %1 = vector.broadcast %cst : f32 to vector<2x256x32xf32>
    %2 = arith.maximumf %0, %1 : vector<2x256x32xf32>
    %3 = arith.mulf %2, %2 : vector<2x256x32xf32>
    %4 = arith.mulf %3, %2 : vector<2x256x32xf32>
    %cst_2 = arith.constant dense<0.000000e+00> : vector<2x32xf32>
    %5 = vector.multi_reduction <add>, %4, %cst_2 [1] : vector<2x256x32xf32> to vector<2x32xf32>
    %cst_3 = arith.constant 3.906250e-03 : f32
    %6 = vector.broadcast %cst_3 : f32 to vector<2x32xf32>
    %7 = arith.mulf %5, %6 : vector<2x32xf32>
    %8 = math.log %7 : vector<2x32xf32>
    %cst_4 = arith.constant 0.333333343 : f32
    %9 = vector.broadcast %cst_4 : f32 to vector<2x32xf32>
    %10 = arith.mulf %8, %9 : vector<2x32xf32>
    %11 = math.exp %10 : vector<2x32xf32>
    %c0_5 = arith.constant 0 : index
    %c0_6 = arith.constant 0 : index
    %12 = vector.load %arg4[%c0_5, %c0_6] : memref<2x32xf32, #tpu.memory_space<vmem>>, vector<2x32xf32>
    tpu.vector_store %arg4[%c0_5, %c0_6], %11 {strides = array<i32>} : memref<2x32xf32, #tpu.memory_space<vmem>>, vector<2x32xf32>,
    %c0_7 = arith.constant 0 : index
    %c0_8 = arith.constant 0 : index
    %13 = vector.load %arg2[%c0_7, %c0_8] : memref<1x32xf32, #tpu.memory_space<vmem>>, vector<1x32xf32>
    %14 = vector.broadcast %13 : vector<1x32xf32> to vector<2x32xf32>
    %15 = arith.mulf %11, %14 : vector<2x32xf32>
    %c0_9 = arith.constant 0 : index
    %c0_10 = arith.constant 0 : index
    %16 = vector.load %arg3[%c0_9, %c0_10] : memref<1x32xf32, #tpu.memory_space<vmem>>, vector<1x32xf32>
    %17 = vector.broadcast %16 : vector<1x32xf32> to vector<2x32xf32>
    %18 = arith.addf %15, %17 : vector<2x32xf32>
    %c0_11 = arith.constant 0 : index
    %c0_12 = arith.constant 0 : index
    %19 = vector.load %arg5[%c0_11, %c0_12] : memref<2x32xf32, #tpu.memory_space<vmem>>, vector<2x32xf32>
    tpu.vector_store %arg5[%c0_11, %c0_12], %18 {strides = array<i32>} : memref<2x32xf32, #tpu.memory_space<vmem>>, vector<2x32xf32>,
    return
  }
  func.func @transform_0(%arg0: i32) -> (i32, i32, i32) {
    %c0_i32 = arith.constant 0 : i32
    %c0_i32_0 = arith.constant 0 : i32
    %c0_i32_1 = arith.constant 0 : i32
    return %arg0, %c0_i32, %c0_i32_0 : i32, i32, i32
  }
  func.func @transform_1(%arg0: i32) -> (i32, i32) {
    %c0_i32 = arith.constant 0 : i32
    %c0_i32_0 = arith.constant 0 : i32
    %c0_i32_1 = arith.constant 0 : i32
    return %c0_i32, %c0_i32_0 : i32, i32
  }
  func.func @transform_2(%arg0: i32) -> (i32, i32) {
    %c0_i32 = arith.constant 0 : i32
    %c0_i32_0 = arith.constant 0 : i32
    %c0_i32_1 = arith.constant 0 : i32
    return %c0_i32, %c0_i32_0 : i32, i32
  }
  func.func @transform_3(%arg0: i32) -> (i32, i32) {
    %c0_i32 = arith.constant 0 : i32
    %c0_i32_0 = arith.constant 0 : i32
    return %arg0, %c0_i32 : i32, i32
  }
  func.func @transform_4(%arg0: i32) -> (i32, i32) {
    %c0_i32 = arith.constant 0 : i32
    %c0_i32_0 = arith.constant 0 : i32
    return %arg0, %c0_i32 : i32, i32
  }
}

</mosaic_0001>

<bundles_post_ra>
// kernel: tpu_custom_call.1
= control target key start
LH: loop header
LB: loop body
LE: loop exit
PB: predicated region body
PF: predicated region fallthrough
CT: control target
= control target key end

     0   :  { %10 = vsyncpa [#allocation3], 0  ;;  %s1024_s0 = inlined_call_operand.vmem [shape: f32[2,256,32], index: 0, kind: input, shape index: {}]   ;;  %s1025_s1 = inlined_call_operand.vmem [shape: f32[1,32], index: 1, kind: input, shape index: {}]   ;;  %s1026_s2 = inlined_call_operand.vmem [shape: f32[1,32], index: 2, kind: input, shape index: {}]   ;;  %s1027_s3 = inlined_call_operand.hbm [shape: f32[2,32], index: 3, kind: output, shape index: {0}]   ;;  %s1028_s4 = inlined_call_operand.hbm [shape: f32[2,32], index: 4, kind: output, shape index: {1}]  }
   0x1   :  { %11 = vsyncpa [#allocation5], 0  ;;  %v18_v0 = vld [vmem:[%s1024_s0] sm:$0xff]  ;;  %v19_v1 = vld [vmem:[%s1024_s0 + $0x8] sm:$0xff]  ;;  %vm274_vm0 = vcmask 261120   ;;  %s546_s14 = smov [#allocation2]  }
   0x2   :  { %v20_v2 = vld [vmem:[%s1024_s0 + $0x10] sm:$0xff]  ;;  %v21_v3 = vld [vmem:[%s1024_s0 + $0x18] sm:$0xff]  ;;  %v22_v4 = vld [vmem:[%s1024_s0 + $0x20] sm:$0xff]  ;;  %v82_v7 = vmax.f32 %v18_v0, 1e-06  ;;  %s455_s15 = sshll.u32 %s546_s14, 4  ;;  %s456_s15 = int_to_ptr.vmem [resolvable:$true] %s455_s15 }
   0x3   :  { %v23_v5 = vld [vmem:[%s1024_s0 + $0x28] sm:$0xff]  ;;  %v24_v6 = vld [vmem:[%s1024_s0 + $0x30] sm:$0xff]  ;;  %v83_v8 = vmax.f32 %v19_v1, 1e-06  ;;  %v25_v9 = vld [vmem:[%s1024_s0 + $0x38] sm:$0xff]  ;;  %s457_s18 = sshll.u32 %s1027_s3, 4  ;;  %s458_s18 = int_to_ptr.hbm [resolvable:$true] %s457_s18 }
   0x4   :  { %v26_v10 = vld [vmem:[%s1024_s0 + $0x40] sm:$0xff]  ;;  %v27_v11 = vld [vmem:[%s1024_s0 + $0x48] sm:$0xff]  ;;  %v28_v12 = vld [vmem:[%s1024_s0 + $0x50] sm:$0xff]  ;;  %v84_v15 = vmax.f32 %v20_v2, 1e-06  ;;  %v146_v22 = vmul.f32 %v82_v7, %v82_v7  ;;  %vm427_vm1 = vcmask 1041409  }
   0x5   :  { %v29_v13 = vld [vmem:[%s1024_s0 + $0x58] sm:$0xff]  ;;  %v30_v14 = vld [vmem:[%s1024_s0 + $0x60] sm:$0xff]  ;;  %v31_v16 = vld [vmem:[%s1024_s0 + $0x68] sm:$0xff]  ;;  %v85_v18 = vmax.f32 %v21_v3, 1e-06  ;;  %v147_v23 = vmul.f32 %v83_v8, %v83_v8  ;;  %vm430_vm2 = vcmask 254976  }
   0x6   :  { %v32_v17 = vld [vmem:[%s1024_s0 + $0x70] sm:$0xff]  ;;  %v86_v19 = vmax.f32 %v22_v4, 1e-06  ;;  %v33_v20 = vld [vmem:[%s1024_s0 + $0x78] sm:$0xff]  ;;  %v87_v21 = vmax.f32 %v23_v5, 1e-06  ;;  %v148_v30 = vmul.f32 %v84_v15, %v84_v15  ;;  %v210_v38 = vmul.f32 %v146_v22, %v82_v7 }
   0x7   :  { %v88_v24 = vmax.f32 %v24_v6, 1e-06  ;;  %v89_v25 = vmax.f32 %v25_v9, 1e-06  ;;  %v90_v26 = vmax.f32 %v26_v10, 1e-06  ;;  %v149_v33 = vmul.f32 %v85_v18, %v85_v18 }
   0x8   :  { %v91_v27 = vmax.f32 %v27_v11, 1e-06  ;;  %v92_v28 = vmax.f32 %v28_v12, 1e-06  ;;  %v93_v29 = vmax.f32 %v29_v13, 1e-06  ;;  %v150_v34 = vmul.f32 %v86_v19, %v86_v19 }
   0x9   :  { %v94_v31 = vmax.f32 %v30_v14, 1e-06  ;;  %v95_v32 = vmax.f32 %v31_v16, 1e-06  ;;  %v34_v35 = vld [vmem:[%s1024_s0 + $0x80] sm:$0xff]  ;;  %v151_v37 = vmul.f32 %v87_v21, %v87_v21  ;;  %v211_v39 = vmul.f32 %v147_v23, %v83_v8  ;;  %v35_v40 = vld [vmem:[%s1024_s0 + $0x88] sm:$0xff] }
   0xa   :  { %v96_v36 = vmax.f32 %v32_v17, 1e-06  ;;  %v97_v41 = vmax.f32 %v33_v20, 1e-06  ;;  %v152_v42 = vmul.f32 %v88_v24, %v88_v24  ;;  %v153_v43 = vmul.f32 %v89_v25, %v89_v25  ;;  %v36_v49 = vld [vmem:[%s1024_s0 + $0x90] sm:$0xff]  ;;  %v37_v58 = vld [vmem:[%s1024_s0 + $0x98] sm:$0xff] }
   0xb   :  { %v154_v44 = vmul.f32 %v90_v26, %v90_v26  ;;  %v155_v45 = vmul.f32 %v91_v27, %v91_v27  ;;  %v156_v46 = vmul.f32 %v92_v28, %v92_v28  ;;  %v157_v47 = vmul.f32 %v93_v29, %v93_v29  ;;  %v38_v59 = vld [vmem:[%s1024_s0 + $0xa0] sm:$0xff]  ;;  %v39_v60 = vld [vmem:[%s1024_s0 + $0xa8] sm:$0xff]  ;;  %v40_v1 = vld [vmem:[%s1024_s0 + $0xb0] sm:$0xff]  ;;  %s468_s3 = sshll.u32 %s1028_s4, 4  ;;  %s469_s3 = int_to_ptr.hbm [resolvable:$true] %s468_s3 }
   0xc   :  { %v627_v48 = vmul.f32 %v148_v30, %v84_v15  ;;  %v98_v50 = vmax.f32 %v34_v35, 1e-06  ;;  %v158_v51 = vmul.f32 %v94_v31, %v94_v31  ;;  %v159_v52 = vmul.f32 %v95_v32, %v95_v32  ;;  %v41_v2 = vld [vmem:[%s1024_s0 + $0xb8] sm:$0xff]  ;;  %v50_v3 = vld [vmem:[%s1024_s0 + $0x100] sm:$0xff]  ;;  %v51_v4 = vld [vmem:[%s1024_s0 + $0x108] sm:$0xff] }
   0xd   :  { %v632_v53 = vmul.f32 %v149_v33, %v85_v18  ;;  %v634_v54 = vmax.f32 %v35_v40, 1e-06  ;;  %v160_v55 = vmul.f32 %v96_v36, %v96_v36  ;;  %v636_v56 = vmul.f32 %v150_v34, %v86_v19  ;;  %v42_v9 = vld [vmem:[%s1024_s0 + $0xc0] sm:$0xff]  ;;  %v43_v10 = vld [vmem:[%s1024_s0 + $0xc8] sm:$0xff]  ;;  %v52_v11 = vld [vmem:[%s1024_s0 + $0x110] sm:$0xff] }
   0xe   :  { %v638_v57 = vmul.f32 %v151_v37, %v87_v21  ;;  %v161_v61 = vmul.f32 %v97_v41, %v97_v41  ;;  %v649_v62 = vmul.f32 %v152_v42, %v88_v24  ;;  %v651_v63 = vmul.f32 %v153_v43, %v89_v25  ;;  %v44_v15 = vld [vmem:[%s1024_s0 + $0xd0] sm:$0xff]  ;;  %v45_v16 = vld [vmem:[%s1024_s0 + $0xd8] sm:$0xff]  ;;  %v46_v22 = vld [vmem:[%s1024_s0 + $0xe0] sm:$0xff] }
   0xf   :  { %v653_v0 = vmul.f32 %v154_v44, %v90_v26  ;;  %v667_v5 = vmax.f32 %v36_v49, 1e-06  ;;  %v669_v6 = vmul.f32 %v155_v45, %v91_v27  ;;  %v671_v7 = vmul.f32 %v156_v46, %v92_v28  ;;  %v53_v17 = vld [vmem:[%s1024_s0 + $0x118] sm:$0xff]  ;;  %v47_v23 = vld [vmem:[%s1024_s0 + $0xe8] sm:$0xff]  ;;  %v54_v24 = vld [vmem:[%s1024_s0 + $0x120] sm:$0xff] }
  0x10   :  { %v673_v8 = vmul.f32 %v157_v47, %v93_v29  ;;  %v162_v12 = vmul.f32 %v98_v50, %v98_v50  ;;  %v684_v13 = vmul.f32 %v158_v51, %v94_v31  ;;  %v686_v14 = vmul.f32 %v159_v52, %v95_v32  ;;  %v55_v29 = vld [vmem:[%s1024_s0 + $0x128] sm:$0xff]  ;;  %v48_v42 = vld [vmem:[%s1024_s0 + $0xf0] sm:$0xff] }
  0x11   :  { %v697_v18 = vmax.f32 %v37_v58, 1e-06  ;;  %v701_v19 = vmul.f32 %v634_v54, %v634_v54  ;;  %v703_v20 = vmul.f32 %v160_v55, %v96_v36  ;;  %v275_v21 = vsel %vm274_vm0, %v210_v38, 0.0  ;;  %v56_v43 = vld [vmem:[%s1024_s0 + $0x130] sm:$0xff]  ;;  %v49_v55 = vld [vmem:[%s1024_s0 + $0xf8] sm:$0xff] }
  0x12   :  { %v114_v25 = vmax.f32 %v50_v3, 1e-06  ;;  %v115_v26 = vmax.f32 %v51_v4, 1e-06  ;;  %v715_v27 = vmul.f32 %v161_v61, %v97_v41  ;;  %v276_v28 = vsel %vm274_vm0, %v211_v39, 0.0 }
  0x13   :  { %v721_v30 = vmax.f32 %v38_v59, 1e-06  ;;  %v723_v31 = vmax.f32 %v39_v60, 1e-06  ;;  %v116_v32 = vmax.f32 %v52_v11, 1e-06  ;;  %v727_v33 = vmul.f32 %v667_v5, %v667_v5 }
  0x14   :  { %v729_v34 = vmax.f32 %v40_v1, 1e-06  ;;  %v731_v35 = vmax.f32 %v41_v2, 1e-06  ;;  %v117_v36 = vmax.f32 %v53_v17, 1e-06  ;;  %v733_v37 = vmul.f32 %v162_v12, %v98_v50 }
  0x15   :  { %v735_v38 = vmax.f32 %v42_v9, 1e-06  ;;  %v737_v39 = vmax.f32 %v43_v10, 1e-06  ;;  %v739_v40 = vmax.f32 %v44_v15, 1e-06  ;;  %v743_v41 = vmul.f32 %v697_v18, %v697_v18 }
  0x16   :  { %v751_v44 = vmax.f32 %v45_v16, 1e-06  ;;  %v118_v45 = vmax.f32 %v54_v24, 1e-06  ;;  %v178_v46 = vmul.f32 %v114_v25, %v114_v25  ;;  %v179_v47 = vmul.f32 %v115_v26, %v115_v26  ;;  %v57_v1 = vld [vmem:[%s1024_s0 + $0x138] sm:$0xff]  ;;  %v58_v10 = vld [vmem:[%s1024_s0 + $0x140] sm:$0xff] }
  0x17   :  { %v753_v49 = vmax.f32 %v46_v22, 1e-06  ;;  %v755_v50 = vmax.f32 %v47_v23, 1e-06  ;;  %v759_v51 = vmul.f32 %v721_v30, %v721_v30  ;;  %v180_v52 = vmul.f32 %v116_v32, %v116_v32 }
  0x18   :  { %v119_v58 = vmax.f32 %v55_v29, 1e-06  ;;  %v181_v59 = vmul.f32 %v117_v36, %v117_v36  ;;  %v277_v60 = vadd.f32 %v276_v28, %v275_v21  ;;  %v278_v61 = vsel %vm274_vm0, %v627_v48, 0.0 }
  0x19   :  { %v769_v2 = vmax.f32 %v48_v42, 1e-06  ;;  %v120_v3 = vmax.f32 %v56_v43, 1e-06  ;;  %v773_v4 = vmul.f32 %v723_v31, %v723_v31  ;;  %v280_v9 = vsel %vm274_vm0, %v632_v53, 0.0  ;;  %v59_v53 = vld [vmem:[%s1024_s0 + $0x148] sm:$0xff] }
  0x1a   :  { %v182_v11 = vmul.f32 %v118_v45, %v118_v45  ;;  %v242_v48 = vmul.f32 %v178_v46, %v114_v25  ;;  %v243_v12 = vmul.f32 %v179_v47, %v115_v26  ;;  %v279_v15 = vadd.f32 %v278_v61, %v277_v60 }
  0x1b   :  { %v780_v16 = vmax.f32 %v49_v55, 1e-06  ;;  %v784_v17 = vmul.f32 %v729_v34, %v729_v34  ;;  %v244_v21 = vmul.f32 %v180_v52, %v116_v32  ;;  %v282_v22 = vsel %vm274_vm0, %v636_v56, 0.0  ;;  %v60_v56 = vld [vmem:[%s1024_s0 + $0x150] sm:$0xff] }
  0x1c   :  { %v121_v23 = vmax.f32 %v57_v1, 1e-06  ;;  %v183_v24 = vmul.f32 %v119_v58, %v119_v58  ;;  %v245_v28 = vmul.f32 %v181_v59, %v117_v36  ;;  %v281_v25 = vadd.f32 %v280_v9, %v279_v15 }
  0x1d   :  { %v122_v26 = vmax.f32 %v58_v10, 1e-06  ;;  %v793_v29 = vmul.f32 %v731_v35, %v731_v35  ;;  %v184_v42 = vmul.f32 %v120_v3, %v120_v3  ;;  %v284_v32 = vsel %vm274_vm0, %v638_v57, 0.0  ;;  %v61_v57 = vld [vmem:[%s1024_s0 + $0x158] sm:$0xff] }
  0x1e   :  { %v246_v43 = vmul.f32 %v182_v11, %v118_v45  ;;  %v283_v46 = vadd.f32 %v282_v22, %v281_v25  ;;  %v344_v47 = vsel %vm274_vm0, %v242_v48, 0.0  ;;  %v345_v36 = vsel %vm274_vm0, %v243_v12, 0.0  ;;  %v62_v12 = vld [vmem:[%s1024_s0 + $0x160] sm:$0xff] }
  0x1f   :  { %v123_v52 = vmax.f32 %v59_v53, 1e-06  ;;  %v286_v55 = vsel %vm274_vm0, %v649_v62, 0.0  ;;  %v346_v59 = vadd.f32 %v345_v36, %v344_v47  ;;  %v347_v60 = vsel %vm274_vm0, %v244_v21, 0.0 }
  0x20   :  { %v185_v61 = vmul.f32 %v121_v23, %v121_v23  ;;  %v247_v1 = vmul.f32 %v183_v24, %v119_v58  ;;  %v285_v9 = vadd.f32 %v284_v32, %v283_v46  ;;  %v349_v45 = vsel %vm274_vm0, %v245_v28, 0.0  ;;  %v63_v58 = vld [vmem:[%s1024_s0 + $0x168] sm:$0xff]  ;;  %v64_v32 = vld [vmem:[%s1024_s0 + $0x170] sm:$0xff] }
  0x21   :  { %v124_v10 = vmax.f32 %v60_v56, 1e-06  ;;  %v811_v11 = vmul.f32 %v735_v38, %v735_v38  ;;  %v288_v62 = vsel %vm274_vm0, %v651_v63, 0.0  ;;  %v348_v48 = vadd.f32 %v347_v60, %v346_v59  ;;  %v66_v59 = vld [vmem:[%s1024_s0 + $0x180] sm:$0xff] }
  0x22   :  { %v186_v15 = vmul.f32 %v122_v26, %v122_v26  ;;  %v248_v21 = vmul.f32 %v184_v42, %v120_v3  ;;  %v287_v22 = vadd.f32 %v286_v55, %v285_v9  ;;  %v351_v53 = vsel %vm274_vm0, %v246_v43, 0.0 }
  0x23   :  { %v125_v24 = vmax.f32 %v61_v57, 1e-06  ;;  %v824_v28 = vmul.f32 %v737_v39, %v737_v39  ;;  %v290_v63 = vsel %vm274_vm0, %v653_v0, 0.0  ;;  %v350_v25 = vadd.f32 %v349_v45, %v348_v48  ;;  %v65_v0 = vld [vmem:[%s1024_s0 + $0x178] sm:$0xff] }
  0x24   :  { %v187_v56 = vmul.f32 %v123_v52, %v123_v52  ;;  %v249_v46 = vmul.f32 %v185_v61, %v121_v23  ;;  %v289_v47 = vadd.f32 %v288_v62, %v287_v22  ;;  %v353_v3 = vsel %vm274_vm0, %v247_v1, 0.0  ;;  %v67_v62 = vld [vmem:[%s1024_s0 + $0x188] sm:$0xff] }
  0x25   :  { %v126_v42 = vmax.f32 %v62_v12, 1e-06  ;;  %v127_v43 = vmax.f32 %v63_v58, 1e-06  ;;  %v292_v36 = vsel %vm274_vm0, %v669_v6, 0.0  ;;  %v352_v55 = vadd.f32 %v351_v53, %v350_v25 }
  0x26   :  { %v188_v60 = vmul.f32 %v124_v10, %v124_v10  ;;  %v250_v57 = vmul.f32 %v186_v15, %v122_v26  ;;  %v291_v23 = vadd.f32 %v290_v63, %v289_v47  ;;  %v355_v61 = vsel %vm274_vm0, %v248_v21, 0.0  ;;  %v69_v63 = vld [vmem:[%s1024_s0 + $0x198] sm:$0xff] }
  0x27   :  { %v128_v1 = vmax.f32 %v64_v32, 1e-06  ;;  %v843_v9 = vmul.f32 %v739_v40, %v739_v40  ;;  %v294_v6 = vsel %vm274_vm0, %v671_v7, 0.0  ;;  %v354_v45 = vadd.f32 %v353_v3, %v352_v55  ;;  %v68_v7 = vld [vmem:[%s1024_s0 + $0x190] sm:$0xff] }
  0x28   :  { %v189_v48 = vmul.f32 %v125_v24, %v125_v24  ;;  %v251_v12 = vmul.f32 %v187_v56, %v123_v52  ;;  %v293_v58 = vadd.f32 %v292_v36, %v291_v23  ;;  %v357_v26 = vsel %vm274_vm0, %v249_v46, 0.0  ;;  %v70_v36 = vld [vmem:[%s1024_s0 + $0x1a0] sm:$0xff] }
  0x29   :  { %v129_v15 = vmax.f32 %v65_v0, 1e-06  ;;  %v130_v21 = vmax.f32 %v66_v59, 1e-06  ;;  %v296_v22 = vsel %vm274_vm0, %v673_v8, 0.0  ;;  %v356_v53 = vadd.f32 %v355_v61, %v354_v45 }
  0x2a   :  { %v190_v25 = vmul.f32 %v126_v42, %v126_v42  ;;  %v252_v32 = vmul.f32 %v188_v60, %v124_v10  ;;  %v295_v52 = vadd.f32 %v294_v6, %v293_v58  ;;  %v359_v56 = vsel %vm274_vm0, %v250_v57, 0.0 }
  0x2b   :  { %v131_v46 = vmax.f32 %v67_v62, 1e-06  ;;  %v862_v47 = vmul.f32 %v751_v44, %v751_v44  ;;  %v298_v8 = vsel %vm274_vm0, %v684_v13, 0.0  ;;  %v358_v3 = vadd.f32 %v357_v26, %v356_v53  ;;  %v71_v13 = vld [vmem:[%s1024_s0 + $0x1a8] sm:$0xff]  ;;  %v72_v26 = vld [vmem:[%s1024_s0 + $0x1b0] sm:$0xff] }
  0x2c   :  { %v191_v55 = vmul.f32 %v127_v43, %v127_v43  ;;  %v253_v0 = vmul.f32 %v189_v48, %v125_v24  ;;  %v297_v59 = vadd.f32 %v296_v22, %v295_v52  ;;  %v361_v10 = vsel %vm274_vm0, %v251_v12, 0.0 }
  0x2d   :  { %v132_v60 = vmax.f32 %v68_v7, 1e-06  ;;  %v870_v57 = vmax.f32 %v69_v63, 1e-06  ;;  %v300_v23 = vsel %vm274_vm0, %v686_v14, 0.0  ;;  %v360_v61 = vadd.f32 %v359_v56, %v358_v3 }
  0x2e   :  { %v192_v6 = vmul.f32 %v128_v1, %v128_v1  ;;  %v254_v45 = vmul.f32 %v190_v25, %v126_v42  ;;  %v299_v62 = vadd.f32 %v298_v8, %v297_v59  ;;  %v363_v58 = vsel %vm274_vm0, %v252_v32, 0.0 }
  0x2f   :  { %v878_v24 = vmax.f32 %v70_v36, 1e-06  ;;  %v882_v48 = vmul.f32 %v753_v49, %v753_v49  ;;  %v302_v12 = vsel %vm274_vm0, %v703_v20, 0.0  ;;  %v362_v14 = vadd.f32 %v361_v10, %v360_v61 }
  0x30   :  { %v193_v22 = vmul.f32 %v129_v15, %v129_v15  ;;  %v255_v53 = vmul.f32 %v191_v55, %v127_v43  ;;  %v301_v42 = vadd.f32 %v300_v23, %v299_v62  ;;  %v365_v7 = vsel %vm274_vm0, %v253_v0, 0.0  ;;  %v74_v23 = vld [vmem:[%s1024_s0 + $0x1c0] sm:$0xff] }
  0x31   :  { %v890_v63 = vmax.f32 %v71_v13, 1e-06  ;;  %v227_v25 = vmul.f32 %v701_v19, %v634_v54  ;;  %v304_v32 = vsel %vm274_vm0, %v715_v27, 0.0  ;;  %v364_v52 = vadd.f32 %v363_v58, %v362_v14  ;;  %v73_v54 = vld [vmem:[%s1024_s0 + $0x1b8] sm:$0xff] }
  0x32   :  { %v194_v20 = vmul.f32 %v130_v21, %v130_v21  ;;  %v256_v56 = vmul.f32 %v192_v6, %v128_v1  ;;  %v303_v8 = vadd.f32 %v302_v12, %v301_v42  ;;  %v367_v3 = vsel %vm274_vm0, %v254_v45, 0.0 }
  0x33   :  { %v897_v36 = vmax.f32 %v72_v26, 1e-06  ;;  %v228_v43 = vmul.f32 %v727_v33, %v667_v5  ;;  %v306_v55 = vsel %vm274_vm0, %v733_v37, 0.0  ;;  %v366_v0 = vadd.f32 %v365_v7, %v364_v52 }
  0x34   :  { %v195_v19 = vmul.f32 %v131_v46, %v131_v46  ;;  %v257_v27 = vmul.f32 %v193_v22, %v129_v15  ;;  %v305_v59 = vadd.f32 %v304_v32, %v303_v8  ;;  %v369_v1 = vsel %vm274_vm0, %v255_v53, 0.0 }
  0x35   :  { %v909_v10 = vmul.f32 %v755_v50, %v755_v50  ;;  %v229_v5 = vmul.f32 %v743_v41, %v697_v18  ;;  %v308_v33 = vsel %vm274_vm0, %v227_v25, 0.0  ;;  %v368_v37 = vadd.f32 %v367_v3, %v366_v0  ;;  %v75_v18 = vld [vmem:[%s1024_s0 + $0x1c8] sm:$0xff]  ;;  %v77_v0 = vld [vmem:[%s1024_s0 + $0x1d8] sm:$0xff] }
  0x36   :  { %v196_v61 = vmul.f32 %v132_v60, %v132_v60  ;;  %v258_v13 = vmul.f32 %v194_v20, %v130_v21  ;;  %v307_v15 = vadd.f32 %v306_v55, %v305_v59  ;;  %v371_v6 = vsel %vm274_vm0, %v256_v56, 0.0 }
  0x37   :  { %v137_v45 = vmax.f32 %v73_v54, 1e-06  ;;  %v230_v62 = vmul.f32 %v759_v51, %v721_v30  ;;  %v310_v58 = vsel %vm274_vm0, %v228_v43, 0.0  ;;  %v370_v12 = vadd.f32 %v369_v1, %v368_v37 }
  0x38   :  { %v197_v41 = vmul.f32 %v870_v57, %v870_v57  ;;  %v259_v14 = vmul.f32 %v195_v19, %v131_v46  ;;  %v309_v26 = vadd.f32 %v308_v33, %v307_v15  ;;  %v373_v21 = vsel %vm274_vm0, %v257_v27, 0.0 }
  0x39   :  { %v138_v22 = vmax.f32 %v74_v23, 1e-06  ;;  %v231_v53 = vmul.f32 %v773_v4, %v723_v31  ;;  %v312_v30 = vsel %vm274_vm0, %v229_v5, 0.0  ;;  %v372_v51 = vadd.f32 %v371_v6, %v370_v12  ;;  %v76_v31 = vld [vmem:[%s1024_s0 + $0x1d0] sm:$0xff]  ;;  %v78_v5 = vld [vmem:[%s1024_s0 + $0x1e0] sm:$0xff] }
  0x3a   :  { %v198_v42 = vmul.f32 %v878_v24, %v878_v24  ;;  %v260_v7 = vmul.f32 %v196_v61, %v132_v60  ;;  %v311_v25 = vadd.f32 %v310_v58, %v309_v26  ;;  %v375_v32 = vsel %vm274_vm0, %v258_v13, 0.0 }
  0x3b   :  { %v139_v52 = vmax.f32 %v75_v18, 1e-06  ;;  %v232_v46 = vmul.f32 %v784_v17, %v729_v34  ;;  %v314_v20 = vsel %vm274_vm0, %v230_v62, 0.0  ;;  %v374_v56 = vadd.f32 %v373_v21, %v372_v51 }
  0x3c   :  { %v199_v4 = vmul.f32 %v890_v63, %v890_v63  ;;  %v261_v8 = vmul.f32 %v197_v41, %v870_v57  ;;  %v313_v60 = vadd.f32 %v312_v30, %v311_v25  ;;  %v377_v3 = vsel %vm274_vm0, %v259_v14, 0.0  ;;  %v80_v30 = vld [vmem:[%s1024_s0 + $0x1f0] sm:$0xff] }
  0x3d   :  { %v176_v43 = vmul.f32 %v769_v2, %v769_v2  ;;  %v233_v34 = vmul.f32 %v793_v29, %v731_v35  ;;  %v316_v17 = vsel %vm274_vm0, %v231_v53, 0.0  ;;  %v376_v55 = vadd.f32 %v375_v32, %v374_v56 }
  0x3e   :  { %v200_v54 = vmul.f32 %v897_v36, %v897_v36  ;;  %v262_v57 = vmul.f32 %v198_v42, %v878_v24  ;;  %v315_v19 = vadd.f32 %v314_v20, %v313_v60  ;;  %v379_v27 = vsel %vm274_vm0, %v260_v7, 0.0 }
  0x3f   :  { %v140_v59 = vmax.f32 %v76_v31, 1e-06  ;;  %v234_v1 = vmul.f32 %v811_v11, %v735_v38  ;;  %v318_v35 = vsel %vm274_vm0, %v232_v46, 0.0  ;;  %v378_v29 = vadd.f32 %v377_v3, %v376_v55 }
  0x40   :  { %v201_v33 = vmul.f32 %v137_v45, %v137_v45  ;;  %v263_v37 = vmul.f32 %v199_v4, %v890_v63  ;;  %v317_v23 = vadd.f32 %v316_v17, %v315_v19  ;;  %v381_v24 = vsel %vm274_vm0, %v261_v8, 0.0 }
  0x41   :  { %v141_v61 = vmax.f32 %v77_v0, 1e-06  ;;  %v235_v13 = vmul.f32 %v824_v28, %v737_v39  ;;  %v320_v15 = vsel %vm274_vm0, %v233_v34, 0.0  ;;  %v380_v38 = vadd.f32 %v379_v27, %v378_v29  ;;  %v79_v39 = vld [vmem:[%s1024_s0 + $0x1e8] sm:$0xff] }
  0x42   :  { %v202_v11 = vmul.f32 %v138_v22, %v138_v22  ;;  %v264_v6 = vmul.f32 %v200_v54, %v897_v36  ;;  %v319_v62 = vadd.f32 %v318_v35, %v317_v23  ;;  %v383_v58 = vsel %vm274_vm0, %v262_v57, 0.0 }
  0x43   :  { %v142_v12 = vmax.f32 %v78_v5, 1e-06  ;;  %v236_v63 = vmul.f32 %v843_v9, %v739_v40  ;;  %v322_v18 = vsel %vm274_vm0, %v234_v1, 0.0  ;;  %v382_v41 = vadd.f32 %v381_v24, %v380_v38 }
  0x44   :  { %v203_v28 = vmul.f32 %v139_v52, %v139_v52  ;;  %v265_v14 = vmul.f32 %v201_v33, %v137_v45  ;;  %v321_v26 = vadd.f32 %v320_v15, %v319_v62  ;;  %v385_v21 = vsel %vm274_vm0, %v263_v37, 0.0 }
  0x45   :  { %v177_v36 = vmul.f32 %v780_v16, %v780_v16  ;;  %v237_v53 = vmul.f32 %v862_v47, %v751_v44  ;;  %v324_v40 = vsel %vm274_vm0, %v235_v13, 0.0  ;;  %v384_v9 = vadd.f32 %v383_v58, %v382_v41  ;;  %v81_v44 = vld [vmem:[%s1024_s0 + $0x1f8] sm:$0xff] }
  0x46   :  { %v204_v51 = vmul.f32 %v140_v59, %v140_v59  ;;  %v266_v42 = vmul.f32 %v202_v11, %v138_v22  ;;  %v323_v7 = vadd.f32 %v322_v18, %v321_v26  ;;  %v387_v45 = vsel %vm274_vm0, %v264_v6, 0.0 }
  0x47   :  { %v143_v25 = vmax.f32 %v79_v39, 1e-06  ;;  %v238_v32 = vmul.f32 %v882_v48, %v753_v49  ;;  %v326_v46 = vsel %vm274_vm0, %v236_v63, 0.0  ;;  %v386_v20 = vadd.f32 %v385_v21, %v384_v9 }
  0x48   :  { %v205_v47 = vmul.f32 %v141_v61, %v141_v61  ;;  %v267_v56 = vmul.f32 %v203_v28, %v139_v52  ;;  %v325_v31 = vadd.f32 %v324_v40, %v323_v7  ;;  %v389_v4 = vsel %vm274_vm0, %v265_v14, 0.0 }
  0x49   :  { %v144_v22 = vmax.f32 %v80_v30, 1e-06  ;;  %v239_v8 = vmul.f32 %v909_v10, %v755_v50  ;;  %v328_v60 = vsel %vm274_vm0, %v237_v53, 0.0  ;;  %v388_v3 = vadd.f32 %v387_v45, %v386_v20 }
  0x4a   :  { %v206_v49 = vmul.f32 %v142_v12, %v142_v12  ;;  %v268_v48 = vmul.f32 %v204_v51, %v140_v59  ;;  %v327_v34 = vadd.f32 %v326_v46, %v325_v31  ;;  %v391_v17 = vsel %vm274_vm0, %v266_v42, 0.0 }
  0x4b   :  { %v145_v55 = vmax.f32 %v81_v44, 1e-06  ;;  %v240_v0 = vmul.f32 %v176_v43, %v769_v2  ;;  %v330_v52 = vsel %vm274_vm0, %v238_v32, 0.0  ;;  %v390_v54 = vadd.f32 %v389_v4, %v388_v3  ;;  %v484_v3 = vld [vmem:[%s1025_s1] ss:$0 sm:$0xff]  ;;  %s547_s1 = smov [#allocation4]  }
  0x4c   :  { %v207_v57 = vmul.f32 %v143_v25, %v143_v25  ;;  %v269_v19 = vmul.f32 %v205_v47, %v141_v61  ;;  %v329_v27 = vadd.f32 %v328_v60, %v327_v34  ;;  %v393_v1 = vsel %vm274_vm0, %v267_v56, 0.0  ;;  %s466_s21 = sshll.u32 %s547_s1, 4  ;;  %s467_s21 = int_to_ptr.vmem [resolvable:$true] %s466_s21 }
  0x4d   :  { %v241_v50 = vmul.f32 %v177_v36, %v780_v16  ;;  %v332_v10 = vsel %vm274_vm0, %v239_v8, 0.0  ;;  %v392_v35 = vadd.f32 %v391_v17, %v390_v54  ;;  %v208_v59 = vmul.f32 %v144_v22, %v144_v22 }
  0x4e   :  { %v270_v29 = vmul.f32 %v206_v49, %v142_v12  ;;  %v331_v5 = vadd.f32 %v330_v52, %v329_v27  ;;  %v395_v33 = vsel %vm274_vm0, %v268_v48, 0.0  ;;  %v334_v2 = vsel %vm274_vm0, %v240_v0, 0.0  ;;  %v485_v48 = vld [vmem:[%s1026_s2] ss:$0 sm:$0xff] }
  0x4f   :  { %v394_v43 = vadd.f32 %v393_v1, %v392_v35  ;;  %v209_v37 = vmul.f32 %v145_v55, %v145_v55  ;;  %v271_v23 = vmul.f32 %v207_v57, %v143_v25  ;;  %v397_v61 = vsel %vm274_vm0, %v269_v19, 0.0 }
  0x50   :  { %v333_v24 = vadd.f32 %v332_v10, %v331_v5  ;;  %v336_v13 = vsel %vm274_vm0, %v241_v50, 0.0  ;;  %v272_v16 = vmul.f32 %v208_v59, %v144_v22  ;;  %v399_v11 = vsel %vm274_vm0, %v270_v29, 0.0 }
  0x51   :  { %v396_v15 = vadd.f32 %v395_v33, %v394_v43  ;;  %v273_v62 = vmul.f32 %v209_v37, %v145_v55  ;;  %v401_v12 = vsel %vm274_vm0, %v271_v23, 0.0 }
  0x52   :  { %v335_v38 = vadd.f32 %v334_v2, %v333_v24  ;;  %v403_v41 = vsel %vm274_vm0, %v272_v16, 0.0 }
  0x53   :  { %v398_v6 = vadd.f32 %v397_v61, %v396_v15  ;;  %v405_v14 = vsel %vm274_vm0, %v273_v62, 0.0 }
  0x54   :  { %v337_v58 = vadd.f32 %v336_v13, %v335_v38 }
  0x55   :  { %v400_v63 = vadd.f32 %v399_v11, %v398_v6 }
  0x56   :  { %v338_v18 = vrot.slane %v337_v58, 4 }
  0x57   :  { %v402_v39 = vadd.f32 %v401_v12, %v400_v63 }
  0x58   :  { %v339_v28 = vadd.f32 %v338_v18, %v337_v58 }
  0x59   :  { %v404_v26 = vadd.f32 %v403_v41, %v402_v39 }
  0x5a   :  { %v340_v21 = vrot.slane %v339_v28, 2 }
  0x5b   :  { %v406_v36 = vadd.f32 %v405_v14, %v404_v26 }
  0x5c   :  { %v341_v53 = vadd.f32 %v340_v21, %v339_v28 }
  0x5d   :  { %v407_v40 = vrot.slane %v406_v36, 4 }
  0x5e   :  { %v342_v9 = vrot.slane %v341_v53, 1 }
  0x5f   :  { %v408_v30 = vadd.f32 %v407_v40, %v406_v36 }
  0x60   :  { %v343_v51 = vadd.f32 %v342_v9, %v341_v53 }
  0x61   :  { %v409_v42 = vrot.slane %v408_v30, 2 }
  0x62   :  { %v413_v7 = vmul.f32 0.00390625, %v343_v51 }
  0x63   :  { %v410_v45 = vadd.f32 %v409_v42, %v408_v30 }
  0x64   :  { %486 = vlog2.f32 %v413_v7 }
  0x65   :  { %v411_v25 = vrot.slane %v410_v45, 1 }
  0x67   :  { %v412_v32 = vadd.f32 %v411_v25, %v410_v45 }
  0x69   :  { %v414_v46 = vmul.f32 0.00390625, %v412_v32 }
  0x6a   :  { %v487_v20 = vpop.eup %486 }
  0x6b   :  { %v416_v44 = vmul.f32 0.6931472, %v487_v20  ;;  %488 = vlog2.f32 %v414_v46 }
  0x6d   :  { %v419_v47 = vmul.f32 0.33333334, %v416_v44 }
  0x6f   :  { %v421_v56 = vmul.f32 1.442695, %v419_v47 }
  0x71   :  { %v489_v31 = vpop.eup %488  ;;  %490 = vpow2.f32 %v421_v56 }
  0x72   :  { %v418_v4 = vmul.f32 0.6931472, %v489_v31 }
  0x74   :  { %v420_v22 = vmul.f32 0.33333334, %v418_v4 }
  0x76   :  { %v423_v8 = vmul.f32 1.442695, %v420_v22 }
  0x77   :  { %v491_v60 = vpop.eup %490 }
  0x78   :  { %492 = vpow2.f32 %v423_v8  ;;  %v436_v49 = vmul.f32 %v491_v60, %v484_v3 }
  0x7a   :  { %v442_v0 = vadd.f32 %v485_v48, %v436_v49 }
  0x7e   :  { %v493_v34 = vpop.eup %492 }
  0x7f   :  { %v428_v17 = vsel %vm427_vm1, %v493_v34, %v491_v60  ;;  %v437_v55 = vmul.f32 %v493_v34, %v484_v3 }
  0x80   :  { %431 = vst.msk [vmem:[#allocation2] sm:$0x3] %vm430_vm2, %v428_v17 }
  0x81   :  { %v443_v52 = vadd.f32 %v485_v48, %v437_v55  ;;  %460 = dma.vmem_to_hbm [thread:$0]  %s456_s15, 32, %s458_s18, [#allocation3]  }
  0x83   :  { %v446_v54 = vrot.slane %v443_v52, 7 }
  0x85   :  { %v447_v57 = vsel %vm427_vm1, %v446_v54, %v442_v0 }
  0x86   :  { %449 = vst.msk [vmem:[#allocation4] sm:$0x3] %vm430_vm2, %v447_v57 }
  0x87   :  { %471 = dma.vmem_to_hbm [thread:$0]  %s467_s21, 32, %s469_s3, [#allocation5]  }
  0x88   :  { %542 = dma.done.wait [#allocation3], 32  }
  0x89   :  { %543 = vsyncadd [#allocation3], 4294967264 }
  0x8a   :  { %544 = dma.done.wait [#allocation5], 32  }
  0x8b   :  { %545 = vsyncadd [#allocation5], 4294967264 }
  0x8c   :  { %480 = vsyncpa [#allocation3], 1 }
  0x8d   :  { %481 = vsyncpa [#allocation5], 1 }

</bundles_post_ra>
